<compile_context>
chip_gen: v5e
topology: v5e:2x2
jax: 0.10.0
libtpu: 0.0.40
codegen_flags: <defaults>
</compile_context>

<pallas_src>
import functools

import jax
import jax.numpy as jnp
from jax.experimental import pallas as pl
from jax.experimental.pallas import tpu as pltpu


def _round_up(x: int, m: int) -> int:
    return ((x + m - 1) // m) * m


def _deep_mlp_block_kernel(x_ref, w_ref, b_ref, u_ref, o_ref,
                           *, keep_prob: float, apply_dropout: bool):
    # --- Linear: y = x @ W + b  (MXU matmul, f32 accumulate) ---
    y = jnp.dot(x_ref[...], w_ref[...], preferred_element_type=jnp.float32)
    y = y + b_ref[...]                       # (1, Npad) broadcasts over rows

    # --- ReLU (VPU) ---
    y = jnp.maximum(y, 0.0)

    # --- Dropout (training mode): keep w.p. keep_prob, scale by 1/keep_prob ---
    if apply_dropout:
        keep = u_ref[...] < keep_prob        # uniform [0,1) compare, f32 VPU
        y = jnp.where(keep, y * (1.0 / keep_prob), 0.0)

    o_ref[...] = y.astype(o_ref.dtype)


def deep_mlp_block(x, w, b, rng_key, *, dropout_p=0.1, training=True,
                   tile_m_target=256):
    """Pallas implementation of DeepMLPBlock.forward.

    x: (M, K) float32
    w: (K, N) float32   (transpose of torch's nn.Linear weight)
    b: (N,)   float32
    rng_key: jax PRNG key for dropout
    """
    M, K = x.shape
    Kw, N = w.shape
    assert K == Kw

    apply_dropout = bool(training and dropout_p > 0.0)
    keep_prob = 1.0 - float(dropout_p)

    # ---- Pad to TPU-friendly shapes: lane-dense N (mult of 128), sublane M ----
    Npad = _round_up(N, 128)
    Mpad = _round_up(M, 8)
    if Mpad <= tile_m_target:
        tile_m = Mpad                         # single M tile (grid step)
    else:
        tile_m = tile_m_target
        Mpad = _round_up(M, tile_m)

    x_p = jnp.zeros((Mpad, K), x.dtype).at[:M, :].set(x)
    w_p = jnp.zeros((K, Npad), w.dtype).at[:, :N].set(w)
    b_p = jnp.zeros((1, Npad), b.dtype).at[0, :N].set(b)

    if apply_dropout:
        u = jax.random.uniform(rng_key, (Mpad, Npad), jnp.float32)
    else:
        u = jnp.zeros((Mpad, Npad), jnp.float32)   # unused inside the kernel

    kernel = functools.partial(
        _deep_mlp_block_kernel,
        keep_prob=keep_prob,
        apply_dropout=apply_dropout,
    )

    out_p = pl.pallas_call(
        kernel,
        out_shape=jax.ShapeDtypeStruct((Mpad, Npad), x.dtype),
        grid_spec=pltpu.PrefetchScalarGridSpec(
            num_scalar_prefetch=0,
            grid=(Mpad // tile_m,),
            in_specs=[
                pl.BlockSpec((tile_m, K), lambda i: (i, 0)),     # x tile
                pl.BlockSpec((K, Npad), lambda i: (0, 0)),       # full W (resident)
                pl.BlockSpec((1, Npad), lambda i: (0, 0)),       # bias (resident)
                pl.BlockSpec((tile_m, Npad), lambda i: (i, 0)),  # dropout uniforms
            ],
            out_specs=pl.BlockSpec((tile_m, Npad), lambda i: (i, 0)),
        ),
        compiler_params=pltpu.CompilerParams(
            # Tiles are fully independent -> shard across TensorCores (v7x).
            dimension_semantics=("parallel",)),
    )(x_p, w_p, b_p, u)

    return out_p[:M, :N]


if __name__ == "__main__":
    key = jax.random.PRNGKey(0)
    kx, kw, kb, kdrop = jax.random.split(key, 4)

    # Small shapes implied by the module: batch=16, inp_dim=32, out_dim=64.
    M, K, N = 16, 32, 64
    dropout_p = 0.1

    x = jax.random.normal(kx, (M, K), dtype=jnp.float32)
    # Deterministic init mimicking nn.Linear's uniform(-1/sqrt(K), 1/sqrt(K)).
    bound = 1.0 / (K ** 0.5)
    w = jax.random.uniform(kw, (K, N), jnp.float32, -bound, bound)
    b = jax.random.uniform(kb, (N,), jnp.float32, -bound, bound)

    # Training-mode forward (with dropout).
    out = deep_mlp_block(x, w, b, kdrop, dropout_p=dropout_p, training=True)
    out = jax.block_until_ready(out)

    # Eval-mode forward matches ReLU(xW+b) exactly.
    out_eval = deep_mlp_block(x, w, b, kdrop, dropout_p=dropout_p,
                              training=False)
    ref_eval = jnp.maximum(x @ w + b, 0.0)
    assert jnp.allclose(jax.block_until_ready(out_eval), ref_eval,
                        atol=1e-5, rtol=1e-5)

    # Dropout outputs: every element is either 0 or ReLU(xW+b)/(1-p).
    scaled = ref_eval / (1.0 - dropout_p)
    ok = (out == 0.0) | jnp.isclose(out, scaled, atol=1e-5, rtol=1e-5)
    assert bool(jnp.all(ok))

    print("KERNEL_OK")
</pallas_src>

<mosaic_0001>
module attributes {stable_mosaic.version = 11 : i64} {
  func.func @_deep_mlp_block_kernel(%arg0: i32, %arg1: memref<16x32xf32, #tpu.memory_space<vmem>>, %arg2: memref<32x128xf32, #tpu.memory_space<vmem>>, %arg3: memref<1x128xf32, #tpu.memory_space<vmem>>, %arg4: memref<16x128xf32, #tpu.memory_space<vmem>>, %arg5: memref<16x128xf32, #tpu.memory_space<vmem>>) attributes {dimension_semantics = [#tpu.dimension_semantics<parallel>], iteration_bounds = array<i64: 1>, scalar_prefetch = 0 : i64, scratch_operands = 0 : i64, tpu.core_type = #tpu.core_type<tc>, window_params = [{transform_indices = @transform_0, window_bounds = array<i64: 16, 32>}, {pipeline_mode = #tpu.pipeline_mode<synchronous>, transform_indices = @transform_1, window_bounds = array<i64: 32, 128>}, {pipeline_mode = #tpu.pipeline_mode<synchronous>, transform_indices = @transform_2, window_bounds = array<i64: 1, 128>}, {transform_indices = @transform_3, window_bounds = array<i64: 16, 128>}, {transform_indices = @transform_4, window_bounds = array<i64: 16, 128>}]} {
    %c0 = arith.constant 0 : index
    %c0_0 = arith.constant 0 : index
    %0 = vector.load %arg1[%c0, %c0_0] : memref<16x32xf32, #tpu.memory_space<vmem>>, vector<16x32xf32>
    %c0_1 = arith.constant 0 : index
    %c0_2 = arith.constant 0 : index
    %1 = vector.load %arg2[%c0_1, %c0_2] : memref<32x128xf32, #tpu.memory_space<vmem>>, vector<32x128xf32>
    %cst = arith.constant dense<0.000000e+00> : vector<16x128xf32>
    %2 = tpu.matmul %0, %1, %cst {dimension_numbers = #tpu.dot_dimension_numbers<[1], [0], [0], [1], [0, 0, 1, 1], [], []>} : vector<16x32xf32>, vector<32x128xf32>, vector<16x128xf32> -> vector<16x128xf32>
    %c0_3 = arith.constant 0 : index
    %c0_4 = arith.constant 0 : index
    %3 = vector.load %arg3[%c0_3, %c0_4] : memref<1x128xf32, #tpu.memory_space<vmem>>, vector<1x128xf32>
    %4 = vector.broadcast %3 : vector<1x128xf32> to vector<16x128xf32>
    %5 = arith.addf %2, %4 : vector<16x128xf32>
    %cst_5 = arith.constant 0.000000e+00 : f32
    %6 = vector.broadcast %cst_5 : f32 to vector<16x128xf32>
    %7 = arith.maximumf %5, %6 : vector<16x128xf32>
    %c0_6 = arith.constant 0 : index
    %c0_7 = arith.constant 0 : index
    %8 = vector.load %arg4[%c0_6, %c0_7] : memref<16x128xf32, #tpu.memory_space<vmem>>, vector<16x128xf32>
    %cst_8 = arith.constant 0.899999976 : f32
    %9 = vector.broadcast %cst_8 : f32 to vector<16x128xf32>
    %10 = arith.cmpf olt, %8, %9 : vector<16x128xf32>
    %cst_9 = arith.constant 1.11111116 : f32
    %11 = vector.broadcast %cst_9 : f32 to vector<16x128xf32>
    %12 = arith.mulf %7, %11 : vector<16x128xf32>
    %cst_10 = arith.constant 0.000000e+00 : f32
    %13 = vector.broadcast %cst_10 : f32 to vector<16x128xf32>
    %14 = arith.select %10, %12, %13 : vector<16x128xi1>, vector<16x128xf32>
    %c0_11 = arith.constant 0 : index
    %c0_12 = arith.constant 0 : index
    %15 = vector.load %arg5[%c0_11, %c0_12] : memref<16x128xf32, #tpu.memory_space<vmem>>, vector<16x128xf32>
    tpu.vector_store %arg5[%c0_11, %c0_12], %14 {strides = array<i32>} : memref<16x128xf32, #tpu.memory_space<vmem>>, vector<16x128xf32>,
    return
  }
  func.func @transform_0(%arg0: i32) -> (i32, i32) {
    %c0_i32 = arith.constant 0 : i32
    %c0_i32_0 = arith.constant 0 : i32
    return %arg0, %c0_i32 : i32, i32
  }
  func.func @transform_1(%arg0: i32) -> (i32, i32) {
    %c0_i32 = arith.constant 0 : i32
    %c0_i32_0 = arith.constant 0 : i32
    %c0_i32_1 = arith.constant 0 : i32
    return %c0_i32, %c0_i32_0 : i32, i32
  }
  func.func @transform_2(%arg0: i32) -> (i32, i32) {
    %c0_i32 = arith.constant 0 : i32
    %c0_i32_0 = arith.constant 0 : i32
    %c0_i32_1 = arith.constant 0 : i32
    return %c0_i32, %c0_i32_0 : i32, i32
  }
  func.func @transform_3(%arg0: i32) -> (i32, i32) {
    %c0_i32 = arith.constant 0 : i32
    %c0_i32_0 = arith.constant 0 : i32
    return %arg0, %c0_i32 : i32, i32
  }
  func.func @transform_4(%arg0: i32) -> (i32, i32) {
    %c0_i32 = arith.constant 0 : i32
    %c0_i32_0 = arith.constant 0 : i32
    return %arg0, %c0_i32 : i32, i32
  }
}

</mosaic_0001>

<bundles_post_ra>
// kernel: tpu_custom_call.1
= control target key start
LH: loop header
LB: loop body
LE: loop exit
PB: predicated region body
PF: predicated region fallthrough
CT: control target
= control target key end

     0   :  { %9 = vsyncpa [#allocation3], 0  ;;  %s310_s0 = inlined_call_operand.hbm [shape: f32[16,32], index: 0, kind: input, shape index: {}]   ;;  %s311_s1 = inlined_call_operand.hbm [shape: f32[32,128], index: 1, kind: input, shape index: {}]   ;;  %s312_s2 = inlined_call_operand.vmem [shape: f32[1,128], index: 2, kind: input, shape index: {}]   ;;  %s313_s3 = inlined_call_operand.hbm [shape: f32[16,128], index: 3, kind: input, shape index: {}]   ;;  %s314_s4 = inlined_call_operand.hbm [shape: f32[16,128], index: 4, kind: output, shape index: {}]  }
   0x1   :  { %10 = vsyncpa [#allocation6], 0 }
   0x2   :  { %11 = vsyncpa [#allocation4], 0  ;;  %s29_s17 = sshll.u32 %s311_s1, 4  ;;  %s252_s18 = smov [#allocation5]   ;;  %s30_s17 = int_to_ptr.hbm [resolvable:$true] %s29_s17 }
   0x3   :  { %s31_s19 = sshll.u32 %s252_s18, 4  ;;  %s16_s22 = sshll.u32 %s310_s0, 4  ;;  %s32_s19 = int_to_ptr.vmem [resolvable:$true] %s31_s19  ;;  %s17_s22 = int_to_ptr.hbm [resolvable:$true] %s16_s22 }
   0x4   :  { %s253_s23 = smov 128   ;;  %s254_s24 = smov 8  }
   0x5   :  { %37 = dma.hbm_to_vmem [thread:$0]  %s30_s17, 512, %s32_s19, [#allocation6], %s253_s23, %s253_s23, %s254_s24  }
   0x6   :  { %s255_s25 = smov [#allocation2]   ;;  %s44_s1 = sshll.u32 %s313_s3, 4  ;;  %s45_s1 = int_to_ptr.hbm [resolvable:$true] %s44_s1 }
   0x7   :  { %s18_s26 = sshll.u32 %s255_s25, 4  ;;  %s256_s0 = smov [#allocation7]   ;;  %s19_s26 = int_to_ptr.vmem [resolvable:$true] %s18_s26 }
   0x8   :  { %24 = dma.hbm_to_vmem [thread:$0]  %s17_s22, 256, %s19_s26, [#allocation3], %s253_s23, %s253_s23, %s254_s24  }
   0x9   :  { %s46_s29 = sshll.u32 %s256_s0, 4  ;;  %s47_s29 = int_to_ptr.vmem [resolvable:$true] %s46_s29 }
   0xa   :  { %52 = dma.hbm_to_vmem [thread:$0]  %s45_s1, 256, %s47_s29, [#allocation6], %s253_s23, %s253_s23, %s254_s24  }
   0xb   :  { %246 = dma.done.wait [#allocation3], 256  }
   0xc   :  { %247 = vsyncadd [#allocation3], 4294967040 }
   0xd   :  { %248 = dma.done.wait [#allocation6], 768  }
   0xe   :  { %249 = vsyncadd [#allocation6], 4294966528  ;;  %v70_v0 = vld [vmem:[#allocation5 + $0x18] sm:$0xff]  ;;  %v69_v1 = vld [vmem:[#allocation5 + $0x10] sm:$0xff]  ;;  %vm75_vm0 = vcmask 261120   ;;  %s257_s5 = smov [#allocation8]  }
   0xf   :  { %94 = vmatpush.msra.mxu0 %v70_v0  ;;  %139 = vmatpush.msra.mxu1 %v70_v0  ;;  %v68_v2 = vld [vmem:[#allocation5 + $0x8] sm:$0xff]  ;;  %v67_v3 = vld [vmem:[#allocation5] sm:$0xff]  ;;  %v65_v4 = vld [vmem:[#allocation2] sm:$0xff]  ;;  %s121_s6 = sshll.u32 %s257_s5, 4  ;;  %s123_s9 = sshll.u32 %s314_s4, 4  ;;  %s122_s6 = int_to_ptr.vmem [resolvable:$true] %s121_s6  ;;  %s124_s9 = int_to_ptr.hbm [resolvable:$true] %s123_s9 }
  0x10   :  { %v66_v5 = vld [vmem:[#allocation2 + $0x8] sm:$0xff]  ;;  %v149_v6 = vld [vmem:[%s312_s2] ss:$0 sm:$0xff]  ;;  %v107_v10 = vld [vmem:[#allocation7] sm:$0xff] }
  0x11   :  { %95 = vmatpush.msra.mxu0 %v69_v1  ;;  %140 = vmatpush.msra.mxu1 %v69_v1  ;;  %v108_v12 = vld [vmem:[#allocation7 + $0x8] sm:$0xff]  ;;  %vm109_vm1 = vcmp.lt.f32.partialorder %v107_v10, 0.9 }
  0x12   :  { %vm110_vm2 = vcmp.lt.f32.partialorder %v108_v12, 0.9 }
  0x13   :  { %96 = vmatpush.msra.mxu0 %v68_v2  ;;  %141 = vmatpush.msra.mxu1 %v68_v2 }
  0x15   :  { %97 = vmatpush.msra.mxu0 %v67_v3  ;;  %142 = vmatpush.msra.mxu1 %v67_v3 }
  0x16   :  { %137 = vmatmul.msk.f32.vlgmr.msra.gmra.mxu0 %vm75_vm0, %v65_v4  ;;  %138 = vmatmul.msk.f32.vlgmr.msra.gmra.mxu1 %vm75_vm0, %v66_v5 }
  0x93   :  { %v99_v7 = vpop.f32.mrf.mxu0  ;;  %v102_v8 = vpop.f32.mrf.mxu1 }
  0x94   :  { %v100_v9 = vadd.f32 %v149_v6, %v99_v7  ;;  %v103_v11 = vadd.f32 %v149_v6, %v102_v8 }
  0x96   :  { %v105_v13 = vmax.f32 %v100_v9, 0.0  ;;  %v106_v14 = vmax.f32 %v103_v11, 0.0 }
  0x98   :  { %v111_v15 = vmul.f32 1.1111112, %v105_v13  ;;  %v112_v16 = vmul.f32 1.1111112, %v106_v14 }
  0x9a   :  { %v113_v17 = vsel %vm109_vm1, %v111_v15, 0.0  ;;  %v114_v18 = vsel %vm110_vm2, %v112_v16, 0.0 }
  0x9b   :  { %115 = vst [vmem:[#allocation8] sm:$0xff] %v113_v17 }
  0x9c   :  { %116 = vst [vmem:[#allocation8 + $0x8] sm:$0xff] %v114_v18 }
  0x9d   :  { %129 = dma.vmem_to_hbm [thread:$0]  %s122_s6, 256, %s124_s9, [#allocation4], %s253_s23, %s253_s23, %s254_s24  }
  0x9e   :  { %250 = dma.done.wait [#allocation4], 256  }
  0x9f   :  { %251 = vsyncadd [#allocation4], 4294967040 }
  0xa0   :  { %134 = vsyncpa [#allocation3], 1 }
  0xa1   :  { %135 = vsyncpa [#allocation6], 1 }
  0xa2   :  { %136 = vsyncpa [#allocation4], 1 }

</bundles_post_ra>
